<compile_context>
chip_gen: v7x
topology: tpu7x:2x2x1
jax: 0.10.0
libtpu: 0.0.40
codegen_flags: <defaults>
</compile_context>

<pallas_src>
import jax
import jax.numpy as jnp
from jax import lax
from jax.experimental import pallas as pl
from jax.experimental.pallas import tpu as pltpu


# ----------------------------------------------------------------------------
# Fused kernel: input projection + bidirectional GRU recurrence + fc head
# ----------------------------------------------------------------------------
def _bigru_kernel(x_ref, wih_ref, gib_ref, whh_ref, bhn_ref,
                  w1_ref, b1_ref, w2_ref, b2_ref,
                  out_ref, hidden_ref):
    """Single-launch bidirectional GRU + MLP/sigmoid head.

    x_ref   : (B, T, I)  batch-first input (as given to the module)
    wih_ref : (I, 6H)    input weights, column layout [r_f r_b z_f z_b n_f n_b]
    gib_ref : (1, 6H)    b_ih (all gates) + b_hh (r/z gates) pre-folded
    whh_ref : (2H, 6H)   block-diagonal recurrent weights, bf16
    bhn_ref : (1, 2H)    b_hn per direction (gated by r, stays on the n slab)
    w1_ref  : (2H, 1)    fc layer_1 weight;  b1/w2/b2: SMEM scalars
    out_ref : (B, 1)     sigmoid(sigmoid(Linear(relu(Linear(hidden)))))
    hidden_ref: (B, 2H)  hidden_bidirectional = [h_f final | h_b final]
    """
    B, T, I = x_ref.shape
    C = wih_ref.shape[1]
    H = C // 6
    H2, H4 = 2 * H, 4 * H

    # --- hoisted input projection: one MXU matmul for all T steps & both dirs.
    x_flat = x_ref[...].reshape(B * T, I)
    gi = (jnp.dot(x_flat, wih_ref[...], preferred_element_type=jnp.float32)
          + gib_ref[...]).reshape(B, T, C)

    # --- pre-resolve backward-direction time reversal once (off the recurrent
    # critical path): forward columns read x[t], backward columns x[T-1-t].
    col = lax.broadcasted_iota(jnp.int32, (B, C), 1)
    fwd_cols = (col % H2) < H          # even H-blocks = forward-direction cols
    g_steps = [jnp.where(fwd_cols, gi[:, t, :], gi[:, T - 1 - t, :])
               for t in range(T)]

    whh = whh_ref[...]                 # bf16 recurrent weights (pre-cast)
    bhn = bhn_ref[...]                 # (1, 2H)

    # --- serial recurrence, both directions fused:
    # one (B,2H)@(2H,6H) bf16 MXU dot per step, f32 gate math.
    h = jnp.zeros((B, H2), jnp.float32)
    for t in range(T):                 # T=8: full unroll is the right choice
        gh = jnp.dot(h.astype(jnp.bfloat16), whh,
                     preferred_element_type=jnp.float32)            # (B, 6H)
        g = g_steps[t]
        rz = jax.nn.sigmoid(g[:, :H4] + gh[:, :H4])     # [r_f r_b z_f z_b]
        r, z = rz[:, :H2], rz[:, H2:]
        n = jnp.tanh(g[:, H4:] + r * (gh[:, H4:] + bhn))            # [n_f n_b]
        h = (1.0 - z) * n + z * h                                   # [h_f | h_b]

    hidden_ref[...] = h.astype(hidden_ref.dtype)                    # (B, 2H)

    # --- fused fc head: sigmoid(sigmoid(Linear(1,1)(relu(Linear(2H,1)(h)))))
    a1 = jnp.maximum(
        jnp.dot(h, w1_ref[...], preferred_element_type=jnp.float32)
        + b1_ref[0, 0], 0.0)                                        # (B, 1)
    logits = a1 * w2_ref[0, 0] + b2_ref[0, 0]
    out_ref[...] = jax.nn.sigmoid(jax.nn.sigmoid(logits)).astype(out_ref.dtype)


# ----------------------------------------------------------------------------
# Wrapper (no grid: the whole working set is tiny and VMEM-resident)
# ----------------------------------------------------------------------------
def _run_bigru(x, packed):
    B, T, I = x.shape
    C = packed["wih"].shape[1]
    H = C // 6

    def vmem(shape):
        return pl.BlockSpec(shape, lambda: (0,) * len(shape))

    smem = pl.BlockSpec(memory_space=pltpu.MemorySpace.SMEM)

    return pl.pallas_call(
        _bigru_kernel,
        out_shape=(
            jax.ShapeDtypeStruct((B, 1), jnp.float32),
            jax.ShapeDtypeStruct((B, 2 * H), jnp.float32),
        ),
        in_specs=[
            vmem((B, T, I)),          # x
            vmem((I, C)),             # W_ih (both directions, interleaved)
            vmem((1, C)),             # folded input-side biases
            vmem((2 * H, C)),         # block-diagonal W_hh (bf16)
            vmem((1, 2 * H)),         # b_hn
            vmem((2 * H, 1)),         # fc layer_1 weight
            smem, smem, smem,         # fc scalars: b1, w2, b2
        ],
        out_specs=(vmem((B, 1)), vmem((B, 2 * H))),
    )(x, packed["wih"], packed["gib"], packed["whh"], packed["bhn"],
      packed["fc_w1"], packed["fc_b1"], packed["fc_w2"], packed["fc_b2"])


@jax.jit
def bidirectional_rnn_forward(x, packed):
    """x: (B, T, input_size) batch-first.

    Returns:
      out:    (B, 1)     sigmoid(DNN(hidden_bidirectional)) per the module
      hidden: (B, 2H)    hidden_bidirectional = cat(final hidden of each dir)
    """
    return _run_bigru(x, packed)


# ----------------------------------------------------------------------------
# Parameter packing: done ONCE at init (hoisted out of the jitted path).
# Fused column layout [r_f, r_b, z_f, z_b, n_f, n_b].
# ----------------------------------------------------------------------------
def pack_params(p):
    H = p["whh_f"].shape[0]

    def interleave(af, ab):
        return jnp.concatenate(
            [af[:, :H], ab[:, :H],
             af[:, H:2 * H], ab[:, H:2 * H],
             af[:, 2 * H:], ab[:, 2 * H:]], axis=-1)

    wih = interleave(p["wih_f"], p["wih_b"])                          # (I, 6H)

    # fold b_ih (all gates) + b_hh (r,z only) into the input projection
    gib = interleave(p["bih_f"], p["bih_b"]) + interleave(
        p["bhh_f"].at[:, 2 * H:].set(0.0),
        p["bhh_b"].at[:, 2 * H:].set(0.0))                            # (1, 6H)

    # b_hn stays with the recurrent term (gated by r) -- n slab only, (1, 2H)
    bhn = jnp.concatenate([p["bhh_f"][:, 2 * H:], p["bhh_b"][:, 2 * H:]],
                          axis=-1)

    # block-diagonal recurrent weights: h_f drives *_f columns, h_b the *_b
    zHH = jnp.zeros((H, H), jnp.float32)
    wf, wb = p["whh_f"], p["whh_b"]
    row_f = jnp.concatenate(
        [wf[:, :H], zHH, wf[:, H:2 * H], zHH, wf[:, 2 * H:], zHH], axis=-1)
    row_b = jnp.concatenate(
        [zHH, wb[:, :H], zHH, wb[:, H:2 * H], zHH, wb[:, 2 * H:]], axis=-1)
    whh = jnp.concatenate([row_f, row_b], axis=0).astype(jnp.bfloat16)  # (2H,6H)

    return {"wih": wih, "gib": gib, "whh": whh, "bhn": bhn,
            "fc_w1": p["fc_w1"], "fc_b1": p["fc_b1"],
            "fc_w2": p["fc_w2"], "fc_b2": p["fc_b2"]}


# ----------------------------------------------------------------------------
# Deterministic parameter init (PyTorch-style uniform(-1/sqrt(fan), 1/sqrt(fan)))
# ----------------------------------------------------------------------------
def init_params(key, input_size, hidden_size):
    H, I = hidden_size, input_size
    k_gru = 1.0 / jnp.sqrt(jnp.float32(H))
    k_fc1 = 1.0 / jnp.sqrt(jnp.float32(2 * H))
    keys = jax.random.split(key, 12)

    def u(k, shape, scale):
        return jax.random.uniform(k, shape, jnp.float32, -scale, scale)

    p = {}
    # GRU weights stored pre-transposed: (in_features, 3H), gate order [r|z|n]
    p["wih_f"] = u(keys[0], (I, 3 * H), k_gru)
    p["whh_f"] = u(keys[1], (H, 3 * H), k_gru)
    p["bih_f"] = u(keys[2], (1, 3 * H), k_gru)
    p["bhh_f"] = u(keys[3], (1, 3 * H), k_gru)
    p["wih_b"] = u(keys[4], (I, 3 * H), k_gru)
    p["whh_b"] = u(keys[5], (H, 3 * H), k_gru)
    p["bih_b"] = u(keys[6], (1, 3 * H), k_gru)
    p["bhh_b"] = u(keys[7], (1, 3 * H), k_gru)
    # fc head: DeepNeuralNetwork(2H, 1, *()) wrapped in an extra Sigmoid
    p["fc_w1"] = u(keys[8], (2 * H, 1), k_fc1)    # Linear(2H, 1)
    p["fc_b1"] = u(keys[9], (1, 1), k_fc1)
    p["fc_w2"] = u(keys[10], (1, 1), 1.0)         # Linear(1, 1)
    p["fc_b2"] = u(keys[11], (1, 1), 1.0)
    return p


# ----------------------------------------------------------------------------
# Pure-JAX f32 reference (lax.scan) for correctness checking
# ----------------------------------------------------------------------------
def _gru_final_hidden(x, wih_t, whh_t, bih, bhh):
    B = x.shape[0]
    H = whh_t.shape[0]

    def step(h, x_t):
        gi = x_t @ wih_t + bih
        gh = h @ whh_t + bhh
        r = jax.nn.sigmoid(gi[:, :H] + gh[:, :H])
        z = jax.nn.sigmoid(gi[:, H:2 * H] + gh[:, H:2 * H])
        n = jnp.tanh(gi[:, 2 * H:] + r * gh[:, 2 * H:])
        return (1.0 - z) * n + z * h, None

    h0 = jnp.zeros((B, H), jnp.float32)
    h_fin, _ = lax.scan(step, h0, jnp.swapaxes(x, 0, 1))
    return h_fin


def _forward_ref(x, p):
    h1 = _gru_final_hidden(x, p["wih_f"], p["whh_f"], p["bih_f"], p["bhh_f"])
    h2 = _gru_final_hidden(jnp.flip(x, axis=1),
                           p["wih_b"], p["whh_b"], p["bih_b"], p["bhh_b"])
    hidden = jnp.concatenate([h1, h2], axis=-1)
    a1 = jax.nn.relu(hidden @ p["fc_w1"] + p["fc_b1"])
    out = jax.nn.sigmoid(jax.nn.sigmoid(a1 @ p["fc_w2"] + p["fc_b2"]))
    return out, hidden


# ----------------------------------------------------------------------------
if __name__ == "__main__":
    B, T, INPUT_SIZE, HIDDEN = 2, 8, 16, 32

    key = jax.random.PRNGKey(0)
    k_x, k_p = jax.random.split(key)
    x = jax.random.normal(k_x, (B, T, INPUT_SIZE), jnp.float32)
    params = init_params(k_p, INPUT_SIZE, HIDDEN)

    # One-time packing (outside the jitted per-call path).
    packed = pack_params(params)

    out, hidden = bidirectional_rnn_forward(x, packed)
    jax.block_until_ready((out, hidden))

    # Sanity check against the pure-JAX f32 reference.  Tolerance is relaxed
    # because the recurrent matmul operands are bf16 in the kernel.
    out_ref, hidden_ref = _forward_ref(x, params)
    assert out.shape == (B, 1)
    assert hidden.shape == (B, 2 * HIDDEN)
    assert jnp.allclose(out, out_ref, atol=3e-2, rtol=3e-2)
    assert jnp.allclose(hidden, hidden_ref, atol=3e-2, rtol=3e-2)

    print("KERNEL_OK")
</pallas_src>

<mosaic_0001>
module attributes {stable_mosaic.version = 11 : i64} {
  func.func @_bigru_kernel(%arg0: memref<2x8x16xf32, #tpu.memory_space<vmem>>, %arg1: memref<16x192xf32, #tpu.memory_space<vmem>>, %arg2: memref<1x192xf32, #tpu.memory_space<vmem>>, %arg3: memref<64x192xbf16, #tpu.memory_space<vmem>>, %arg4: memref<1x64xf32, #tpu.memory_space<vmem>>, %arg5: memref<64x1xf32, #tpu.memory_space<vmem>>, %arg6: memref<1x1xf32, #tpu.memory_space<smem>>, %arg7: memref<1x1xf32, #tpu.memory_space<smem>>, %arg8: memref<1x1xf32, #tpu.memory_space<smem>>, %arg9: memref<2x1xf32, #tpu.memory_space<vmem>>, %arg10: memref<2x64xf32, #tpu.memory_space<vmem>>) attributes {dimension_semantics = [], scalar_prefetch = 0 : i64, scratch_operands = 0 : i64, tpu.core_type = #tpu.core_type<tc>} {
    %c0 = arith.constant 0 : index
    %c0_0 = arith.constant 0 : index
    %c0_1 = arith.constant 0 : index
    %0 = vector.load %arg0[%c0, %c0_0, %c0_1] : memref<2x8x16xf32, #tpu.memory_space<vmem>>, vector<2x8x16xf32>
    %1 = vector.shape_cast %0 : vector<2x8x16xf32> to vector<16x16xf32>
    %c0_2 = arith.constant 0 : index
    %c0_3 = arith.constant 0 : index
    %2 = vector.load %arg1[%c0_2, %c0_3] : memref<16x192xf32, #tpu.memory_space<vmem>>, vector<16x192xf32>
    %cst = arith.constant dense<0.000000e+00> : vector<16x192xf32>
    %3 = tpu.matmul %1, %2, %cst {dimension_numbers = #tpu.dot_dimension_numbers<[1], [0], [0], [1], [0, 0, 1, 1], [], []>} : vector<16x16xf32>, vector<16x192xf32>, vector<16x192xf32> -> vector<16x192xf32>
    %c0_4 = arith.constant 0 : index
    %c0_5 = arith.constant 0 : index
    %4 = vector.load %arg2[%c0_4, %c0_5] : memref<1x192xf32, #tpu.memory_space<vmem>>, vector<1x192xf32>
    %5 = vector.broadcast %4 : vector<1x192xf32> to vector<16x192xf32>
    %6 = arith.addf %3, %5 : vector<16x192xf32>
    %7 = vector.shape_cast %6 : vector<16x192xf32> to vector<2x8x192xf32>
    %8 = tpu.iota {dimensions = array<i32: 1>} : vector<2x192xi32>
    %c64_i32 = arith.constant 64 : i32
    %c0_i32 = arith.constant 0 : i32
    %9 = arith.cmpi eq, %c64_i32, %c0_i32 : i32
    %c1_i32 = arith.constant 1 : i32
    %10 = arith.select %9, %c1_i32, %c64_i32 : i32
    %11 = vector.broadcast %10 : i32 to vector<2x192xi32>
    %12 = arith.remsi %8, %11 : vector<2x192xi32>
    %c0_i32_6 = arith.constant 0 : i32
    %13 = vector.broadcast %c0_i32_6 : i32 to vector<2x192xi32>
    %14 = arith.cmpi ne, %12, %13 : vector<2x192xi32>
    %c0_i32_7 = arith.constant 0 : i32
    %15 = vector.broadcast %c0_i32_7 : i32 to vector<2x192xi32>
    %16 = arith.cmpi slt, %12, %15 : vector<2x192xi32>
    %c0_i32_8 = arith.constant 0 : i32
    %17 = arith.cmpi slt, %10, %c0_i32_8 : i32
    %18 = vector.broadcast %17 : i1 to vector<2x192xi1>
    %19 = vector.broadcast %18 : vector<2x192xi1> to vector<2x192xi1>
    %20 = arith.xori %16, %19 : vector<2x192xi1>
    %21 = arith.andi %20, %14 : vector<2x192xi1>
    %22 = vector.broadcast %10 : i32 to vector<2x192xi32>
    %23 = arith.addi %12, %22 : vector<2x192xi32>
    %24 = arith.select %21, %23, %12 : vector<2x192xi1>, vector<2x192xi32>
    %c32_i32 = arith.constant 32 : i32
    %25 = vector.broadcast %c32_i32 : i32 to vector<2x192xi32>
    %26 = arith.cmpi slt, %24, %25 : vector<2x192xi32>
    %27 = vector.extract_strided_slice %7 {offsets = [0, 0, 0], sizes = [2, 1, 192], strides = [1, 1, 1]} : vector<2x8x192xf32> to vector<2x1x192xf32>
    %28 = vector.shape_cast %27 : vector<2x1x192xf32> to vector<2x192xf32>
    %29 = vector.extract_strided_slice %7 {offsets = [0, 7, 0], sizes = [2, 1, 192], strides = [1, 1, 1]} : vector<2x8x192xf32> to vector<2x1x192xf32>
    %30 = vector.shape_cast %29 : vector<2x1x192xf32> to vector<2x192xf32>
    %31 = arith.select %26, %28, %30 : vector<2x192xi1>, vector<2x192xf32>
    %32 = vector.extract_strided_slice %7 {offsets = [0, 1, 0], sizes = [2, 1, 192], strides = [1, 1, 1]} : vector<2x8x192xf32> to vector<2x1x192xf32>
    %33 = vector.shape_cast %32 : vector<2x1x192xf32> to vector<2x192xf32>
    %34 = vector.extract_strided_slice %7 {offsets = [0, 6, 0], sizes = [2, 1, 192], strides = [1, 1, 1]} : vector<2x8x192xf32> to vector<2x1x192xf32>
    %35 = vector.shape_cast %34 : vector<2x1x192xf32> to vector<2x192xf32>
    %36 = arith.select %26, %33, %35 : vector<2x192xi1>, vector<2x192xf32>
    %37 = vector.extract_strided_slice %7 {offsets = [0, 2, 0], sizes = [2, 1, 192], strides = [1, 1, 1]} : vector<2x8x192xf32> to vector<2x1x192xf32>
    %38 = vector.shape_cast %37 : vector<2x1x192xf32> to vector<2x192xf32>
    %39 = vector.extract_strided_slice %7 {offsets = [0, 5, 0], sizes = [2, 1, 192], strides = [1, 1, 1]} : vector<2x8x192xf32> to vector<2x1x192xf32>
    %40 = vector.shape_cast %39 : vector<2x1x192xf32> to vector<2x192xf32>
    %41 = arith.select %26, %38, %40 : vector<2x192xi1>, vector<2x192xf32>
    %42 = vector.extract_strided_slice %7 {offsets = [0, 3, 0], sizes = [2, 1, 192], strides = [1, 1, 1]} : vector<2x8x192xf32> to vector<2x1x192xf32>
    %43 = vector.shape_cast %42 : vector<2x1x192xf32> to vector<2x192xf32>
    %44 = vector.extract_strided_slice %7 {offsets = [0, 4, 0], sizes = [2, 1, 192], strides = [1, 1, 1]} : vector<2x8x192xf32> to vector<2x1x192xf32>
    %45 = vector.shape_cast %44 : vector<2x1x192xf32> to vector<2x192xf32>
    %46 = arith.select %26, %43, %45 : vector<2x192xi1>, vector<2x192xf32>
    %47 = vector.extract_strided_slice %7 {offsets = [0, 4, 0], sizes = [2, 1, 192], strides = [1, 1, 1]} : vector<2x8x192xf32> to vector<2x1x192xf32>
    %48 = vector.shape_cast %47 : vector<2x1x192xf32> to vector<2x192xf32>
    %49 = vector.extract_strided_slice %7 {offsets = [0, 3, 0], sizes = [2, 1, 192], strides = [1, 1, 1]} : vector<2x8x192xf32> to vector<2x1x192xf32>
    %50 = vector.shape_cast %49 : vector<2x1x192xf32> to vector<2x192xf32>
    %51 = arith.select %26, %48, %50 : vector<2x192xi1>, vector<2x192xf32>
    %52 = vector.extract_strided_slice %7 {offsets = [0, 5, 0], sizes = [2, 1, 192], strides = [1, 1, 1]} : vector<2x8x192xf32> to vector<2x1x192xf32>
    %53 = vector.shape_cast %52 : vector<2x1x192xf32> to vector<2x192xf32>
    %54 = vector.extract_strided_slice %7 {offsets = [0, 2, 0], sizes = [2, 1, 192], strides = [1, 1, 1]} : vector<2x8x192xf32> to vector<2x1x192xf32>
    %55 = vector.shape_cast %54 : vector<2x1x192xf32> to vector<2x192xf32>
    %56 = arith.select %26, %53, %55 : vector<2x192xi1>, vector<2x192xf32>
    %57 = vector.extract_strided_slice %7 {offsets = [0, 6, 0], sizes = [2, 1, 192], strides = [1, 1, 1]} : vector<2x8x192xf32> to vector<2x1x192xf32>
    %58 = vector.shape_cast %57 : vector<2x1x192xf32> to vector<2x192xf32>
    %59 = vector.extract_strided_slice %7 {offsets = [0, 1, 0], sizes = [2, 1, 192], strides = [1, 1, 1]} : vector<2x8x192xf32> to vector<2x1x192xf32>
    %60 = vector.shape_cast %59 : vector<2x1x192xf32> to vector<2x192xf32>
    %61 = arith.select %26, %58, %60 : vector<2x192xi1>, vector<2x192xf32>
    %62 = vector.extract_strided_slice %7 {offsets = [0, 7, 0], sizes = [2, 1, 192], strides = [1, 1, 1]} : vector<2x8x192xf32> to vector<2x1x192xf32>
    %63 = vector.shape_cast %62 : vector<2x1x192xf32> to vector<2x192xf32>
    %64 = vector.extract_strided_slice %7 {offsets = [0, 0, 0], sizes = [2, 1, 192], strides = [1, 1, 1]} : vector<2x8x192xf32> to vector<2x1x192xf32>
    %65 = vector.shape_cast %64 : vector<2x1x192xf32> to vector<2x192xf32>
    %66 = arith.select %26, %63, %65 : vector<2x192xi1>, vector<2x192xf32>
    %c0_9 = arith.constant 0 : index
    %c0_10 = arith.constant 0 : index
    %67 = vector.load %arg3[%c0_9, %c0_10] : memref<64x192xbf16, #tpu.memory_space<vmem>>, vector<64x192xbf16>
    %c0_11 = arith.constant 0 : index
    %c0_12 = arith.constant 0 : index
    %68 = vector.load %arg4[%c0_11, %c0_12] : memref<1x64xf32, #tpu.memory_space<vmem>>, vector<1x64xf32>
    %cst_13 = arith.constant 0.000000e+00 : f32
    %69 = vector.broadcast %cst_13 : f32 to vector<2x64xf32>
    %70 = arith.truncf %69 : vector<2x64xf32> to vector<2x64xbf16>
    %cst_14 = arith.constant dense<0.000000e+00> : vector<2x192xf32>
    %71 = tpu.matmul %70, %67, %cst_14 {dimension_numbers = #tpu.dot_dimension_numbers<[1], [0], [0], [1], [0, 0, 1, 1], [], []>} : vector<2x64xbf16>, vector<64x192xbf16>, vector<2x192xf32> -> vector<2x192xf32>
    %72 = vector.extract_strided_slice %31 {offsets = [0, 0], sizes = [2, 128], strides = [1, 1]} : vector<2x192xf32> to vector<2x128xf32>
    %73 = vector.extract_strided_slice %71 {offsets = [0, 0], sizes = [2, 128], strides = [1, 1]} : vector<2x192xf32> to vector<2x128xf32>
    %74 = arith.addf %72, %73 : vector<2x128xf32>
    %75 = arith.negf %74 : vector<2x128xf32>
    %76 = math.exp %75 : vector<2x128xf32>
    %cst_15 = arith.constant 1.000000e+00 : f32
    %77 = vector.broadcast %cst_15 : f32 to vector<2x128xf32>
    %78 = arith.addf %77, %76 : vector<2x128xf32>
    %79 = arith.divf %77, %78 : vector<2x128xf32>
    %80 = vector.extract_strided_slice %79 {offsets = [0, 0], sizes = [2, 64], strides = [1, 1]} : vector<2x128xf32> to vector<2x64xf32>
    %81 = vector.extract_strided_slice %79 {offsets = [0, 64], sizes = [2, 64], strides = [1, 1]} : vector<2x128xf32> to vector<2x64xf32>
    %82 = vector.extract_strided_slice %31 {offsets = [0, 128], sizes = [2, 64], strides = [1, 1]} : vector<2x192xf32> to vector<2x64xf32>
    %83 = vector.extract_strided_slice %71 {offsets = [0, 128], sizes = [2, 64], strides = [1, 1]} : vector<2x192xf32> to vector<2x64xf32>
    %84 = vector.broadcast %68 : vector<1x64xf32> to vector<2x64xf32>
    %85 = arith.addf %83, %84 : vector<2x64xf32>
    %86 = arith.mulf %80, %85 : vector<2x64xf32>
    %87 = arith.addf %82, %86 : vector<2x64xf32>
    %88 = math.tanh %87 : vector<2x64xf32>
    %cst_16 = arith.constant 1.000000e+00 : f32
    %89 = vector.broadcast %cst_16 : f32 to vector<2x64xf32>
    %90 = arith.subf %89, %81 : vector<2x64xf32>
    %91 = arith.mulf %90, %88 : vector<2x64xf32>
    %92 = arith.mulf %81, %69 : vector<2x64xf32>
    %93 = arith.addf %91, %92 : vector<2x64xf32>
    %94 = arith.truncf %93 : vector<2x64xf32> to vector<2x64xbf16>
    %cst_17 = arith.constant dense<0.000000e+00> : vector<2x192xf32>
    %95 = tpu.matmul %94, %67, %cst_17 {dimension_numbers = #tpu.dot_dimension_numbers<[1], [0], [0], [1], [0, 0, 1, 1], [], []>} : vector<2x64xbf16>, vector<64x192xbf16>, vector<2x192xf32> -> vector<2x192xf32>
    %96 = vector.extract_strided_slice %36 {offsets = [0, 0], sizes = [2, 128], strides = [1, 1]} : vector<2x192xf32> to vector<2x128xf32>
    %97 = vector.extract_strided_slice %95 {offsets = [0, 0], sizes = [2, 128], strides = [1, 1]} : vector<2x192xf32> to vector<2x128xf32>
    %98 = arith.addf %96, %97 : vector<2x128xf32>
    %99 = arith.negf %98 : vector<2x128xf32>
    %100 = math.exp %99 : vector<2x128xf32>
    %cst_18 = arith.constant 1.000000e+00 : f32
    %101 = vector.broadcast %cst_18 : f32 to vector<2x128xf32>
    %102 = arith.addf %101, %100 : vector<2x128xf32>
    %103 = arith.divf %101, %102 : vector<2x128xf32>
    %104 = vector.extract_strided_slice %103 {offsets = [0, 0], sizes = [2, 64], strides = [1, 1]} : vector<2x128xf32> to vector<2x64xf32>
    %105 = vector.extract_strided_slice %103 {offsets = [0, 64], sizes = [2, 64], strides = [1, 1]} : vector<2x128xf32> to vector<2x64xf32>
    %106 = vector.extract_strided_slice %36 {offsets = [0, 128], sizes = [2, 64], strides = [1, 1]} : vector<2x192xf32> to vector<2x64xf32>
    %107 = vector.extract_strided_slice %95 {offsets = [0, 128], sizes = [2, 64], strides = [1, 1]} : vector<2x192xf32> to vector<2x64xf32>
    %108 = vector.broadcast %68 : vector<1x64xf32> to vector<2x64xf32>
    %109 = arith.addf %107, %108 : vector<2x64xf32>
    %110 = arith.mulf %104, %109 : vector<2x64xf32>
    %111 = arith.addf %106, %110 : vector<2x64xf32>
    %112 = math.tanh %111 : vector<2x64xf32>
    %cst_19 = arith.constant 1.000000e+00 : f32
    %113 = vector.broadcast %cst_19 : f32 to vector<2x64xf32>
    %114 = arith.subf %113, %105 : vector<2x64xf32>
    %115 = arith.mulf %114, %112 : vector<2x64xf32>
    %116 = arith.mulf %105, %93 : vector<2x64xf32>
    %117 = arith.addf %115, %116 : vector<2x64xf32>
    %118 = arith.truncf %117 : vector<2x64xf32> to vector<2x64xbf16>
    %cst_20 = arith.constant dense<0.000000e+00> : vector<2x192xf32>
    %119 = tpu.matmul %118, %67, %cst_20 {dimension_numbers = #tpu.dot_dimension_numbers<[1], [0], [0], [1], [0, 0, 1, 1], [], []>} : vector<2x64xbf16>, vector<64x192xbf16>, vector<2x192xf32> -> vector<2x192xf32>
    %120 = vector.extract_strided_slice %41 {offsets = [0, 0], sizes = [2, 128], strides = [1, 1]} : vector<2x192xf32> to vector<2x128xf32>
    %121 = vector.extract_strided_slice %119 {offsets = [0, 0], sizes = [2, 128], strides = [1, 1]} : vector<2x192xf32> to vector<2x128xf32>
    %122 = arith.addf %120, %121 : vector<2x128xf32>
    %123 = arith.negf %122 : vector<2x128xf32>
    %124 = math.exp %123 : vector<2x128xf32>
    %cst_21 = arith.constant 1.000000e+00 : f32
    %125 = vector.broadcast %cst_21 : f32 to vector<2x128xf32>
    %126 = arith.addf %125, %124 : vector<2x128xf32>
    %127 = arith.divf %125, %126 : vector<2x128xf32>
    %128 = vector.extract_strided_slice %127 {offsets = [0, 0], sizes = [2, 64], strides = [1, 1]} : vector<2x128xf32> to vector<2x64xf32>
    %129 = vector.extract_strided_slice %127 {offsets = [0, 64], sizes = [2, 64], strides = [1, 1]} : vector<2x128xf32> to vector<2x64xf32>
    %130 = vector.extract_strided_slice %41 {offsets = [0, 128], sizes = [2, 64], strides = [1, 1]} : vector<2x192xf32> to vector<2x64xf32>
    %131 = vector.extract_strided_slice %119 {offsets = [0, 128], sizes = [2, 64], strides = [1, 1]} : vector<2x192xf32> to vector<2x64xf32>
    %132 = vector.broadcast %68 : vector<1x64xf32> to vector<2x64xf32>
    %133 = arith.addf %131, %132 : vector<2x64xf32>
    %134 = arith.mulf %128, %133 : vector<2x64xf32>
    %135 = arith.addf %130, %134 : vector<2x64xf32>
    %136 = math.tanh %135 : vector<2x64xf32>
    %cst_22 = arith.constant 1.000000e+00 : f32
    %137 = vector.broadcast %cst_22 : f32 to vector<2x64xf32>
    %138 = arith.subf %137, %129 : vector<2x64xf32>
    %139 = arith.mulf %138, %136 : vector<2x64xf32>
    %140 = arith.mulf %129, %117 : vector<2x64xf32>
    %141 = arith.addf %139, %140 : vector<2x64xf32>
    %142 = arith.truncf %141 : vector<2x64xf32> to vector<2x64xbf16>
    %cst_23 = arith.constant dense<0.000000e+00> : vector<2x192xf32>
    %143 = tpu.matmul %142, %67, %cst_23 {dimension_numbers = #tpu.dot_dimension_numbers<[1], [0], [0], [1], [0, 0, 1, 1], [], []>} : vector<2x64xbf16>, vector<64x192xbf16>, vector<2x192xf32> -> vector<2x192xf32>
    %144 = vector.extract_strided_slice %46 {offsets = [0, 0], sizes = [2, 128], strides = [1, 1]} : vector<2x192xf32> to vector<2x128xf32>
    %145 = vector.extract_strided_slice %143 {offsets = [0, 0], sizes = [2, 128], strides = [1, 1]} : vector<2x192xf32> to vector<2x128xf32>
    %146 = arith.addf %144, %145 : vector<2x128xf32>
    %147 = arith.negf %146 : vector<2x128xf32>
    %148 = math.exp %147 : vector<2x128xf32>
    %cst_24 = arith.constant 1.000000e+00 : f32
    %149 = vector.broadcast %cst_24 : f32 to vector<2x128xf32>
    %150 = arith.addf %149, %148 : vector<2x128xf32>
    %151 = arith.divf %149, %150 : vector<2x128xf32>
    %152 = vector.extract_strided_slice %151 {offsets = [0, 0], sizes = [2, 64], strides = [1, 1]} : vector<2x128xf32> to vector<2x64xf32>
    %153 = vector.extract_strided_slice %151 {offsets = [0, 64], sizes = [2, 64], strides = [1, 1]} : vector<2x128xf32> to vector<2x64xf32>
    %154 = vector.extract_strided_slice %46 {offsets = [0, 128], sizes = [2, 64], strides = [1, 1]} : vector<2x192xf32> to vector<2x64xf32>
    %155 = vector.extract_strided_slice %143 {offsets = [0, 128], sizes = [2, 64], strides = [1, 1]} : vector<2x192xf32> to vector<2x64xf32>
    %156 = vector.broadcast %68 : vector<1x64xf32> to vector<2x64xf32>
    %157 = arith.addf %155, %156 : vector<2x64xf32>
    %158 = arith.mulf %152, %157 : vector<2x64xf32>
    %159 = arith.addf %154, %158 : vector<2x64xf32>
    %160 = math.tanh %159 : vector<2x64xf32>
    %cst_25 = arith.constant 1.000000e+00 : f32
    %161 = vector.broadcast %cst_25 : f32 to vector<2x64xf32>
    %162 = arith.subf %161, %153 : vector<2x64xf32>
    %163 = arith.mulf %162, %160 : vector<2x64xf32>
    %164 = arith.mulf %153, %141 : vector<2x64xf32>
    %165 = arith.addf %163, %164 : vector<2x64xf32>
    %166 = arith.truncf %165 : vector<2x64xf32> to vector<2x64xbf16>
    %cst_26 = arith.constant dense<0.000000e+00> : vector<2x192xf32>
    %167 = tpu.matmul %166, %67, %cst_26 {dimension_numbers = #tpu.dot_dimension_numbers<[1], [0], [0], [1], [0, 0, 1, 1], [], []>} : vector<2x64xbf16>, vector<64x192xbf16>, vector<2x192xf32> -> vector<2x192xf32>
    %168 = vector.extract_strided_slice %51 {offsets = [0, 0], sizes = [2, 128], strides = [1, 1]} : vector<2x192xf32> to vector<2x128xf32>
    %169 = vector.extract_strided_slice %167 {offsets = [0, 0], sizes = [2, 128], strides = [1, 1]} : vector<2x192xf32> to vector<2x128xf32>
    %170 = arith.addf %168, %169 : vector<2x128xf32>
    %171 = arith.negf %170 : vector<2x128xf32>
    %172 = math.exp %171 : vector<2x128xf32>
    %cst_27 = arith.constant 1.000000e+00 : f32
    %173 = vector.broadcast %cst_27 : f32 to vector<2x128xf32>
    %174 = arith.addf %173, %172 : vector<2x128xf32>
    %175 = arith.divf %173, %174 : vector<2x128xf32>
    %176 = vector.extract_strided_slice %175 {offsets = [0, 0], sizes = [2, 64], strides = [1, 1]} : vector<2x128xf32> to vector<2x64xf32>
    %177 = vector.extract_strided_slice %175 {offsets = [0, 64], sizes = [2, 64], strides = [1, 1]} : vector<2x128xf32> to vector<2x64xf32>
    %178 = vector.extract_strided_slice %51 {offsets = [0, 128], sizes = [2, 64], strides = [1, 1]} : vector<2x192xf32> to vector<2x64xf32>
    %179 = vector.extract_strided_slice %167 {offsets = [0, 128], sizes = [2, 64], strides = [1, 1]} : vector<2x192xf32> to vector<2x64xf32>
    %180 = vector.broadcast %68 : vector<1x64xf32> to vector<2x64xf32>
    %181 = arith.addf %179, %180 : vector<2x64xf32>
    %182 = arith.mulf %176, %181 : vector<2x64xf32>
    %183 = arith.addf %178, %182 : vector<2x64xf32>
    %184 = math.tanh %183 : vector<2x64xf32>
    %cst_28 = arith.constant 1.000000e+00 : f32
    %185 = vector.broadcast %cst_28 : f32 to vector<2x64xf32>
    %186 = arith.subf %185, %177 : vector<2x64xf32>
    %187 = arith.mulf %186, %184 : vector<2x64xf32>
    %188 = arith.mulf %177, %165 : vector<2x64xf32>
    %189 = arith.addf %187, %188 : vector<2x64xf32>
    %190 = arith.truncf %189 : vector<2x64xf32> to vector<2x64xbf16>
    %cst_29 = arith.constant dense<0.000000e+00> : vector<2x192xf32>
    %191 = tpu.matmul %190, %67, %cst_29 {dimension_numbers = #tpu.dot_dimension_numbers<[1], [0], [0], [1], [0, 0, 1, 1], [], []>} : vector<2x64xbf16>, vector<64x192xbf16>, vector<2x192xf32> -> vector<2x192xf32>
    %192 = vector.extract_strided_slice %56 {offsets = [0, 0], sizes = [2, 128], strides = [1, 1]} : vector<2x192xf32> to vector<2x128xf32>
    %193 = vector.extract_strided_slice %191 {offsets = [0, 0], sizes = [2, 128], strides = [1, 1]} : vector<2x192xf32> to vector<2x128xf32>
    %194 = arith.addf %192, %193 : vector<2x128xf32>
    %195 = arith.negf %194 : vector<2x128xf32>
    %196 = math.exp %195 : vector<2x128xf32>
    %cst_30 = arith.constant 1.000000e+00 : f32
    %197 = vector.broadcast %cst_30 : f32 to vector<2x128xf32>
    %198 = arith.addf %197, %196 : vector<2x128xf32>
    %199 = arith.divf %197, %198 : vector<2x128xf32>
    %200 = vector.extract_strided_slice %199 {offsets = [0, 0], sizes = [2, 64], strides = [1, 1]} : vector<2x128xf32> to vector<2x64xf32>
    %201 = vector.extract_strided_slice %199 {offsets = [0, 64], sizes = [2, 64], strides = [1, 1]} : vector<2x128xf32> to vector<2x64xf32>
    %202 = vector.extract_strided_slice %56 {offsets = [0, 128], sizes = [2, 64], strides = [1, 1]} : vector<2x192xf32> to vector<2x64xf32>
    %203 = vector.extract_strided_slice %191 {offsets = [0, 128], sizes = [2, 64], strides = [1, 1]} : vector<2x192xf32> to vector<2x64xf32>
    %204 = vector.broadcast %68 : vector<1x64xf32> to vector<2x64xf32>
    %205 = arith.addf %203, %204 : vector<2x64xf32>
    %206 = arith.mulf %200, %205 : vector<2x64xf32>
    %207 = arith.addf %202, %206 : vector<2x64xf32>
    %208 = math.tanh %207 : vector<2x64xf32>
    %cst_31 = arith.constant 1.000000e+00 : f32
    %209 = vector.broadcast %cst_31 : f32 to vector<2x64xf32>
    %210 = arith.subf %209, %201 : vector<2x64xf32>
    %211 = arith.mulf %210, %208 : vector<2x64xf32>
    %212 = arith.mulf %201, %189 : vector<2x64xf32>
    %213 = arith.addf %211, %212 : vector<2x64xf32>
    %214 = arith.truncf %213 : vector<2x64xf32> to vector<2x64xbf16>
    %cst_32 = arith.constant dense<0.000000e+00> : vector<2x192xf32>
    %215 = tpu.matmul %214, %67, %cst_32 {dimension_numbers = #tpu.dot_dimension_numbers<[1], [0], [0], [1], [0, 0, 1, 1], [], []>} : vector<2x64xbf16>, vector<64x192xbf16>, vector<2x192xf32> -> vector<2x192xf32>
    %216 = vector.extract_strided_slice %61 {offsets = [0, 0], sizes = [2, 128], strides = [1, 1]} : vector<2x192xf32> to vector<2x128xf32>
    %217 = vector.extract_strided_slice %215 {offsets = [0, 0], sizes = [2, 128], strides = [1, 1]} : vector<2x192xf32> to vector<2x128xf32>
    %218 = arith.addf %216, %217 : vector<2x128xf32>
    %219 = arith.negf %218 : vector<2x128xf32>
    %220 = math.exp %219 : vector<2x128xf32>
    %cst_33 = arith.constant 1.000000e+00 : f32
    %221 = vector.broadcast %cst_33 : f32 to vector<2x128xf32>
    %222 = arith.addf %221, %220 : vector<2x128xf32>
    %223 = arith.divf %221, %222 : vector<2x128xf32>
    %224 = vector.extract_strided_slice %223 {offsets = [0, 0], sizes = [2, 64], strides = [1, 1]} : vector<2x128xf32> to vector<2x64xf32>
    %225 = vector.extract_strided_slice %223 {offsets = [0, 64], sizes = [2, 64], strides = [1, 1]} : vector<2x128xf32> to vector<2x64xf32>
    %226 = vector.extract_strided_slice %61 {offsets = [0, 128], sizes = [2, 64], strides = [1, 1]} : vector<2x192xf32> to vector<2x64xf32>
    %227 = vector.extract_strided_slice %215 {offsets = [0, 128], sizes = [2, 64], strides = [1, 1]} : vector<2x192xf32> to vector<2x64xf32>
    %228 = vector.broadcast %68 : vector<1x64xf32> to vector<2x64xf32>
    %229 = arith.addf %227, %228 : vector<2x64xf32>
    %230 = arith.mulf %224, %229 : vector<2x64xf32>
    %231 = arith.addf %226, %230 : vector<2x64xf32>
    %232 = math.tanh %231 : vector<2x64xf32>
    %cst_34 = arith.constant 1.000000e+00 : f32
    %233 = vector.broadcast %cst_34 : f32 to vector<2x64xf32>
    %234 = arith.subf %233, %225 : vector<2x64xf32>
    %235 = arith.mulf %234, %232 : vector<2x64xf32>
    %236 = arith.mulf %225, %213 : vector<2x64xf32>
    %237 = arith.addf %235, %236 : vector<2x64xf32>
    %238 = arith.truncf %237 : vector<2x64xf32> to vector<2x64xbf16>
    %cst_35 = arith.constant dense<0.000000e+00> : vector<2x192xf32>
    %239 = tpu.matmul %238, %67, %cst_35 {dimension_numbers = #tpu.dot_dimension_numbers<[1], [0], [0], [1], [0, 0, 1, 1], [], []>} : vector<2x64xbf16>, vector<64x192xbf16>, vector<2x192xf32> -> vector<2x192xf32>
    %240 = vector.extract_strided_slice %66 {offsets = [0, 0], sizes = [2, 128], strides = [1, 1]} : vector<2x192xf32> to vector<2x128xf32>
    %241 = vector.extract_strided_slice %239 {offsets = [0, 0], sizes = [2, 128], strides = [1, 1]} : vector<2x192xf32> to vector<2x128xf32>
    %242 = arith.addf %240, %241 : vector<2x128xf32>
    %243 = arith.negf %242 : vector<2x128xf32>
    %244 = math.exp %243 : vector<2x128xf32>
    %cst_36 = arith.constant 1.000000e+00 : f32
    %245 = vector.broadcast %cst_36 : f32 to vector<2x128xf32>
    %246 = arith.addf %245, %244 : vector<2x128xf32>
    %247 = arith.divf %245, %246 : vector<2x128xf32>
    %248 = vector.extract_strided_slice %247 {offsets = [0, 0], sizes = [2, 64], strides = [1, 1]} : vector<2x128xf32> to vector<2x64xf32>
    %249 = vector.extract_strided_slice %247 {offsets = [0, 64], sizes = [2, 64], strides = [1, 1]} : vector<2x128xf32> to vector<2x64xf32>
    %250 = vector.extract_strided_slice %66 {offsets = [0, 128], sizes = [2, 64], strides = [1, 1]} : vector<2x192xf32> to vector<2x64xf32>
    %251 = vector.extract_strided_slice %239 {offsets = [0, 128], sizes = [2, 64], strides = [1, 1]} : vector<2x192xf32> to vector<2x64xf32>
    %252 = vector.broadcast %68 : vector<1x64xf32> to vector<2x64xf32>
    %253 = arith.addf %251, %252 : vector<2x64xf32>
    %254 = arith.mulf %248, %253 : vector<2x64xf32>
    %255 = arith.addf %250, %254 : vector<2x64xf32>
    %256 = math.tanh %255 : vector<2x64xf32>
    %cst_37 = arith.constant 1.000000e+00 : f32
    %257 = vector.broadcast %cst_37 : f32 to vector<2x64xf32>
    %258 = arith.subf %257, %249 : vector<2x64xf32>
    %259 = arith.mulf %258, %256 : vector<2x64xf32>
    %260 = arith.mulf %249, %237 : vector<2x64xf32>
    %261 = arith.addf %259, %260 : vector<2x64xf32>
    %c0_38 = arith.constant 0 : index
    %c0_39 = arith.constant 0 : index
    %262 = vector.load %arg10[%c0_38, %c0_39] : memref<2x64xf32, #tpu.memory_space<vmem>>, vector<2x64xf32>
    tpu.vector_store %arg10[%c0_38, %c0_39], %261 {strides = array<i32>} : memref<2x64xf32, #tpu.memory_space<vmem>>, vector<2x64xf32>,
    %c0_40 = arith.constant 0 : index
    %c0_41 = arith.constant 0 : index
    %263 = vector.load %arg5[%c0_40, %c0_41] : memref<64x1xf32, #tpu.memory_space<vmem>>, vector<64x1xf32>
    %cst_42 = arith.constant dense<0.000000e+00> : vector<2x1xf32>
    %264 = tpu.matmul %261, %263, %cst_42 {dimension_numbers = #tpu.dot_dimension_numbers<[1], [0], [0], [1], [0, 0, 1, 1], [], []>} : vector<2x64xf32>, vector<64x1xf32>, vector<2x1xf32> -> vector<2x1xf32>
    %c0_43 = arith.constant 0 : index
    %c0_44 = arith.constant 0 : index
    %265 = memref.load %arg6[%c0_43, %c0_44] : memref<1x1xf32, #tpu.memory_space<smem>>
    %266 = vector.broadcast %265 : f32 to vector<2x1xf32>
    %267 = arith.addf %264, %266 : vector<2x1xf32>
    %cst_45 = arith.constant 0.000000e+00 : f32
    %268 = vector.broadcast %cst_45 : f32 to vector<2x1xf32>
    %269 = arith.maximumf %267, %268 : vector<2x1xf32>
    %c0_46 = arith.constant 0 : index
    %c0_47 = arith.constant 0 : index
    %270 = memref.load %arg7[%c0_46, %c0_47] : memref<1x1xf32, #tpu.memory_space<smem>>
    %271 = vector.broadcast %270 : f32 to vector<2x1xf32>
    %272 = arith.mulf %269, %271 : vector<2x1xf32>
    %c0_48 = arith.constant 0 : index
    %c0_49 = arith.constant 0 : index
    %273 = memref.load %arg8[%c0_48, %c0_49] : memref<1x1xf32, #tpu.memory_space<smem>>
    %274 = vector.broadcast %273 : f32 to vector<2x1xf32>
    %275 = arith.addf %272, %274 : vector<2x1xf32>
    %276 = arith.negf %275 : vector<2x1xf32>
    %277 = math.exp %276 : vector<2x1xf32>
    %cst_50 = arith.constant 1.000000e+00 : f32
    %278 = vector.broadcast %cst_50 : f32 to vector<2x1xf32>
    %279 = arith.addf %278, %277 : vector<2x1xf32>
    %280 = arith.divf %278, %279 : vector<2x1xf32>
    %281 = arith.negf %280 : vector<2x1xf32>
    %282 = math.exp %281 : vector<2x1xf32>
    %cst_51 = arith.constant 1.000000e+00 : f32
    %283 = vector.broadcast %cst_51 : f32 to vector<2x1xf32>
    %284 = arith.addf %283, %282 : vector<2x1xf32>
    %285 = arith.divf %283, %284 : vector<2x1xf32>
    %c0_52 = arith.constant 0 : index
    %c0_53 = arith.constant 0 : index
    %286 = vector.load %arg9[%c0_52, %c0_53] : memref<2x1xf32, #tpu.memory_space<vmem>>, vector<2x1xf32>
    tpu.vector_store %arg9[%c0_52, %c0_53], %285 {strides = array<i32>} : memref<2x1xf32, #tpu.memory_space<vmem>>, vector<2x1xf32>,
    return
  }
}

</mosaic_0001>

<bundles_post_ra>
// kernel: bidirectional_rnn_forward.1
= control target key start
LH: loop header
LB: loop body
LE: loop exit
PB: predicated region body
PF: predicated region fallthrough
CT: control target
= control target key end

     0   :  { %19 = vsyncpa [#allocation6], 0  ;;  %s1675_s0 = inlined_call_operand.vmem [shape: f32[2,8,16], index: 0, kind: input, shape index: {}]   ;;  %s1676_s1 = inlined_call_operand.hbm [shape: f32[16,192], index: 1, kind: input, shape index: {}]   ;;  %s1677_s2 = inlined_call_operand.vmem [shape: f32[1,192], index: 2, kind: input, shape index: {}]   ;;  %s1678_s3 = inlined_call_operand.vmem [shape: bf16[64,192], index: 3, kind: input, shape index: {}]   ;;  %s1679_s4 = inlined_call_operand.vmem [shape: f32[1,64], index: 4, kind: input, shape index: {}]   ;;  %s1680_s5 = inlined_call_operand.vmem [shape: f32[64,1], index: 5, kind: input, shape index: {}]   ;;  %s1681_s6 = inlined_call_operand.<no memory space> [shape: f32[1,1], index: 6, kind: input, shape index: {}]   ;;  %s1682_s7 = inlined_call_operand.<no memory space> [shape: f32[1,1], index: 7, kind: input, shape index: {}]   ;;  %s1683_s8 = inlined_call_operand.<no memory space> [shape: f32[1,1], index: 8, kind: input, shape index: {}]   ;;  %s1684_s9 = inlined_call_operand.vmem [shape: f32[2,1], index: 9, kind: output, shape index: {0}]   ;;  %s1685_s10 = inlined_call_operand.hbm [shape: f32[2,64], index: 10, kind: output, shape index: {1}]  }
   0x1   :  { %20 = vsyncpa [#allocation7], 0  ;;  %s1179_s13 = smov [#allocation5]   ;;  %s1131_s17 = scalar_lea.hbm %s1676_s1, 512 }
   0x2   :  { %s28_s14 = sshll.u32 %s1179_s13, 4  ;;  %p1132_p0 = scmp.ne.s32.totalorder %s1676_s1, %s1131_s17  ;;  %s29_s14 = int_to_ptr.vmem [resolvable:$true] %s28_s14 }
   0x3   :  { %p1135_p1 = scmp.lt.u32.totalorder %s1131_s17, %s1676_s1 }
   0x5   :  { %p1137_p2 = pnand %p1135_p1, %p1132_p0 }
   0x7   :  { %1140 = shalt.err (!%p1137_p2)
}
   0x8   :  { %s1141_s22 = scalar_lea.vmem %s29_s14, 512  ;;  %p1146_p4 = scmp.lt.s32.totalorder %s29_s14, %s29_s14 }
   0x9   :  { %p1142_p3 = scmp.ne.s32.totalorder %s29_s14, %s1141_s22  ;;  %p1147_p5 = scmp.lt.s32.totalorder %s1141_s22, %s1141_s22 }
   0xb   :  { %p1148_p6 = por %p1147_p5, %p1146_p4 }
   0xd   :  { %p1149_p7 = pnand %p1148_p6, %p1142_p3 }
   0xf   :  { %1152 = shalt.err (!%p1149_p7)
}
  0x10   :  { %s1180_s23 = smov 256   ;;  %s1181_s24 = smov 16  }
  0x11   :  { %34 = dma.hbm_to_vmem [thread:$0]  %s1676_s1, 512, %s29_s14, [#allocation6], %s1180_s23, %s1180_s23, %s1181_s24  }
  0x12   :  { %1175 = dma.done.wait [#allocation6], 512  }
  0x13   :  { %1176 = vsyncadd [#allocation6], 4294966784  ;;  %v1182_v0 = vmov 0.0   ;;  %v1183_v1 = vmov 0   ;;  %v56_v2 = vld [vmem:[#allocation5 + $0x8] sm:$0xff]  ;;  %v58_v3 = vld [vmem:[#allocation5 + $0x18] sm:$0xff]  ;;  %v61_v18 = vlaneseq }
  0x14   :  { %142 = vmatprep.mubr.f32.mxu0 %v1182_v0  ;;  %350 = vmatprep.mubr.bf16.mxu1 %v1183_v1  ;;  %v1038_v4 = vpack.c.bf16 %v58_v3, %v56_v2  ;;  %v1260_v5 = vld [vmem:[%s1678_s3 + $0x4] ss:$8 sps:$4 sm:$0xff]   ;;  %v57_v7 = vld [vmem:[#allocation5 + $0x10] sm:$0xff]  ;;  %v1265_v8 = vld [vmem:[%s1678_s3] ss:$8 sps:$4 sm:$0xff]   ;;  %vm71_vm0 = vcmask 130048  }
  0x15   :  { %v55_v6 = vld [vmem:[#allocation5] sm:$0xff]  ;;  %318 = vmatprep.subr.bf16.mxu1 %v1260_v5  ;;  %v1271_v10 = vld [vmem:[%s1678_s3 + $0x14] ss:$8 sps:$4 sm:$0xff]   ;;  %v1277_v11 = vld [vmem:[%s1678_s3 + $0x10] ss:$8 sps:$4 sm:$0xff]   ;;  %v62_v19 = vshrl.u32 %v61_v18, 7 }
  0x16   :  { %1039 = vmatprep.subr.bf16.mxu0 %v1038_v4  ;;  %v1040_v9 = vpack.c.bf16 %v57_v7, %v55_v6  ;;  %319 = vmatpush1.bf16.msra.mxu1 %v1265_v8  ;;  %v53_v12 = vld [vmem:[%s1675_s0] sm:$0xff]  ;;  %v54_v15 = vld [vmem:[%s1675_s0 + $0x8] sm:$0xff]  ;;  %v1303_v16 = vld [vmem:[%s1678_s3 + $0x34] ss:$8 sps:$4 sm:$0xff]   ;;  %v156_v20 = vand.u32 127, %v61_v18  ;;  %vm189_vm2 = vcmask 1041409  }
  0x17   :  { %320 = vmatprep.subr.bf16.mxu1 %v1271_v10  ;;  %v1286_v13 = vld [vmem:[%s1678_s3 + $0x24] ss:$8 sps:$4 sm:$0xff]   ;;  %v1293_v14 = vld [vmem:[%s1678_s3 + $0x20] ss:$8 sps:$4 sm:$0xff]   ;;  %v1311_v17 = vld [vmem:[%s1678_s3 + $0x30] ss:$8 sps:$4 sm:$0xff]  }
  0x18   :  { %1041 = vmatpush1.bf16.msra.mxu0 %v1040_v9  ;;  %v63_v21 = vsub.s32 0, %v62_v19  ;;  %v59_v22 = vld [vmem:[%s1677_s2] sm:$0x3]  ;;  %v67_v23 = vsub.s32 1, %v62_v19  ;;  %v157_v24 = vadd.s32 128, %v156_v20  ;;  %v162_v26 = vand.u32 63, %v156_v20 }
  0x19   :  { %391 = vmatprep.subr.bf16.mxu0 %v1260_v5  ;;  %s1184_s27 = smov 64   ;;  %vm314_vm4 = vcmask 523264   ;;  %vm1186_vm5 = vmmov 0   ;;  %vm857_vm6 = vcmask 517120   ;;  %s1187_s22 = smov [#allocation8]  }
  0x1a   :  { %321 = vmatpush1.bf16.msra.mxu1 %v1277_v11  ;;  %v64_v25 = vrot.slane %v59_v22, %v63_v21  ;;  %v68_v27 = vrot.slane %v59_v22, %v67_v23  ;;  %v169_v28 = vand.u32 63, %v157_v24  ;;  %vm1338_vm1 = vcmp.lt.s32.totalorder %v162_v26, 32 }
  0x1b   :  { %981 = vmatmul.mubr.msk.f32.vlgmr.msra.gmra.mrb[0].mxu0 %vm71_vm0, %v53_v12  ;;  %322 = vmatprep.subr.bf16.mxu1 %v1286_v13 }
  0x1c   :  { %148 = vmatprep.mubr.f32.mxu0 %v1182_v0  ;;  %392 = vmatpush1.bf16.msra.mxu0 %v1265_v8  ;;  %vm1344_vm3 = vcmp.lt.s32.totalorder %v169_v28, 32 }
  0x1d   :  { %393 = vmatprep.subr.bf16.mxu0 %v1271_v10 }
  0x1e   :  { %323 = vmatpush1.bf16.msra.mxu1 %v1293_v14 }
  0x1f   :  { %982 = vmatmul.mubr.msk.f32.gmra.mrb[2].mxu0 %vm71_vm0, %v54_v15  ;;  %324 = vmatprep.subr.bf16.mxu1 %v1303_v16 }
  0x20   :  { %423 = vmatprep.mubr.bf16.mxu0 %v1183_v1  ;;  %394 = vmatpush1.bf16.msra.mxu0 %v1277_v11 }
  0x21   :  { %395 = vmatprep.subr.bf16.mxu0 %v1286_v13 }
  0x22   :  { %325 = vmatpush1.bf16.msra.mxu1 %v1311_v17 }
  0x23   :  { %458 = vmatprep.subr.bf16.mxu1 %v1260_v5 }
  0x24   :  { %396 = vmatpush1.bf16.msra.mxu0 %v1293_v14 }
  0x25   :  { %351 = vmatmul.mubr.bf16.vlgmr.msra.gmra.mrb[0].mxu1 %v1183_v1  ;;  %397 = vmatprep.subr.bf16.mxu0 %v1303_v16 }
  0x26   :  { %459 = vmatpush1.bf16.msra.mxu1 %v1265_v8  ;;  %490 = vmatprep.mubr.bf16.mxu1 %v1183_v1 }
  0x27   :  { %460 = vmatprep.subr.bf16.mxu1 %v1271_v10 }
  0x28   :  { %398 = vmatpush1.bf16.msra.mxu0 %v1311_v17 }
  0x29   :  { %525 = vmatprep.subr.bf16.mxu0 %v1260_v5 }
  0x2a   :  { %461 = vmatpush1.bf16.msra.mxu1 %v1277_v11 }
  0x2b   :  { %462 = vmatprep.subr.bf16.mxu1 %v1286_v13 }
  0x2e   :  { %463 = vmatpush1.bf16.msra.mxu1 %v1293_v14 }
  0x2f   :  { %464 = vmatprep.subr.bf16.mxu1 %v1303_v16 }
  0x32   :  { %465 = vmatpush1.bf16.msra.mxu1 %v1311_v17 }
  0x33   :  { %592 = vmatprep.subr.bf16.mxu1 %v1260_v5 }
  0xee   :  { %v144_v29 = vpop.f32.mrb[0].mxu0 }
  0xef   :  { %v1336_v30 = vadd.f32 %v144_v29, %v64_v25  ;;  %v146_v31 = vpop.f32.mrb[1].mxu0 }
  0xf0   :  { %v1342_v33 = vadd.f32 %v146_v31, %v68_v27 }
  0xf1   :  { %v195_v35 = vrot.slane %v1336_v30, 7  ;;  %v205_v36 = vrot.slane %v1336_v30, 1  ;;  %v211_v37 = vrot.slane %v1336_v30, 6  ;;  %v221_v42 = vrot.slane %v1336_v30, 2 }
  0xf2   :  { %v150_v38 = vpop.f32.mrb[2].mxu0  ;;  %v198_v39 = vrot.slane %v1342_v33, 7  ;;  %v207_v40 = vrot.slane %v1342_v33, 1  ;;  %v214_v41 = vrot.slane %v1342_v33, 6  ;;  %v229_v45 = vrot.slane %v1336_v30, 5 }
  0xf3   :  { %v151_v43 = vadd.f32 %v150_v38, %v64_v25  ;;  %v152_v44 = vpop.f32.mrb[3].mxu0  ;;  %v224_v46 = vrot.slane %v1342_v33, 2  ;;  %v232_v47 = vrot.slane %v1342_v33, 5  ;;  %v239_v49 = vrot.slane %v1336_v30, 3 }
  0xf4   :  { %v153_v48 = vadd.f32 %v152_v44, %v68_v27  ;;  %v247_v50 = vrot.slane %v1336_v30, 4  ;;  %v242_v51 = vrot.slane %v1342_v33, 3  ;;  %v250_v28 = vrot.slane %v1342_v33, 4 }
  0xf5   :  { %v188_v52 = vrot.slane %v151_v43, 7  ;;  %v196_v53 = vrot.slane %v151_v43, 6  ;;  %v1362_v54 = vsel %vm189_vm2, %v151_v43, %v205_v36  ;;  %v212_v55 = vrot.slane %v151_v43, 5 }
  0xf6   :  { %v191_v56 = vrot.slane %v153_v48, 7  ;;  %v199_v57 = vrot.slane %v153_v48, 6  ;;  %v1365_v58 = vsel %vm189_vm2, %v153_v48, %v207_v40  ;;  %v215_v59 = vrot.slane %v153_v48, 5 }
  0xf7   :  { %v1369_v60 = vsel %vm189_vm2, %v188_v52, %v1336_v30  ;;  %v1372_v61 = vsel %vm189_vm2, %v196_v53, %v195_v35  ;;  %v1375_v62 = vsel %vm189_vm2, %v212_v55, %v211_v37  ;;  %v222_v63 = vrot.slane %v151_v43, 1 }
  0xf8   :  { %v203_v2 = vsel %vm1338_vm1, %v1369_v60, %v1372_v61  ;;  %v1383_v3 = vsel %vm189_vm2, %v191_v56, %v1342_v33  ;;  %v1386_v4 = vsel %vm189_vm2, %v199_v57, %v198_v39  ;;  %v219_v6 = vsel %vm1338_vm1, %v1362_v54, %v1375_v62  ;;  %v352_v7 = vpop.f32.mrb[0].mxu1  ;;  %v1479_v56 = vld [vmem:[%s1679_s4] ss:$0 sm:$0xff] }
  0xf9   :  { %v204_v9 = vsel %vm1344_vm3, %v1383_v3, %v1386_v4  ;;  %v1397_v12 = vsel %vm189_vm2, %v215_v59, %v214_v41  ;;  %v1400_v15 = vsel %vm189_vm2, %v222_v63, %v221_v42  ;;  %v230_v18 = vrot.slane %v151_v43, 4  ;;  %v354_v20 = vpop.f32.mrb[1].mxu1 }
  0xfa   :  { %v359_v19 = vadd.f32 %v352_v7, %v203_v2  ;;  %v220_v21 = vsel %vm1344_vm3, %v1365_v58, %v1397_v12  ;;  %v225_v22 = vrot.slane %v153_v48, 1  ;;  %v233_v23 = vrot.slane %v153_v48, 4  ;;  %v356_v24 = vpop.f32.mrb[2].mxu1 }
  0xfb   :  { %v1407_v25 = vsel %vm189_vm2, %v230_v18, %v229_v45  ;;  %v240_v26 = vrot.slane %v151_v43, 2  ;;  %v248_v27 = vrot.slane %v151_v43, 3  ;;  %v357_v30 = vpop.f32.mrb[3].mxu1  ;;  %v243_v39 = vrot.slane %v153_v48, 2 }
  0xfc   :  { %v991_v29 = vmul.f32 -1.442695, %v359_v19  ;;  %v237_v31 = vsel %vm1338_vm1, %v1400_v15, %v1407_v25  ;;  %v1415_v35 = vsel %vm189_vm2, %v225_v22, %v224_v46  ;;  %v1418_v36 = vsel %vm189_vm2, %v233_v23, %v232_v47 }
  0xfd   :  { %v238_v37 = vsel %vm1344_vm3, %v1415_v35, %v1418_v36  ;;  %v1425_v33 = vsel %vm189_vm2, %v240_v26, %v239_v49  ;;  %v1428_v38 = vsel %vm189_vm2, %v248_v27, %v247_v50  ;;  %v251_v41 = vrot.slane %v153_v48, 3 }
  0xfe   :  { %1075 = vpow2.f32 %v991_v29  ;;  %v255_v40 = vsel %vm1338_vm1, %v1425_v33, %v1428_v38  ;;  %v257_v42 = vsel %vm1338_vm1, %v1428_v38, %v1425_v33  ;;  %v1439_v43 = vsel %vm189_vm2, %v243_v39, %v242_v51 }
  0xff   :  { %v259_v44 = vsel %vm1338_vm1, %v1407_v25, %v1400_v15  ;;  %v260_v45 = vsel %vm1344_vm3, %v1418_v36, %v1415_v35  ;;  %v261_v46 = vsel %vm1338_vm1, %v1375_v62, %v1362_v54  ;;  %v1454_v47 = vsel %vm189_vm2, %v251_v41, %v250_v28 }
 0x100   :  { %v262_v48 = vsel %vm1344_vm3, %v1397_v12, %v1365_v58  ;;  %v263_v49 = vsel %vm1338_vm1, %v1372_v61, %v1369_v60  ;;  %v264_v50 = vsel %vm1344_vm3, %v1386_v4, %v1383_v3  ;;  %v256_v51 = vsel %vm1344_vm3, %v1439_v43, %v1454_v47  ;;  %v859_v60 = vld [vmem:[%s1680_s5] sm:$0xff]  ;;  %v860_v61 = vld [vmem:[%s1680_s5 + $0x8] sm:$0xff]  ;;  %v862_v3 = vld [vmem:[%s1680_s5 + $0x18] sm:$0xff] }
 0x101   :  { %v258_v52 = vsel %vm1344_vm3, %v1454_v47, %v1439_v43  ;;  %v372_v57 = vadd.f32 %v1479_v56, %v354_v20  ;;  %v1043_v34 = vpack.c.bf16 %v860_v61, %v859_v60 }
 0x108   :  { %v1076_v53 = vpop.eup %1075 }
 0x109   :  { %v363_v55 = vadd.f32 1.0, %v1076_v53 }
 0x10b   :  { %1077 = vrcp.f32 %v363_v55 }
 0x115   :  { %v1078_v59 = vpop.eup %1077 }
 0x116   :  { %v373_v63 = vmul.f32 %v1078_v59, %v372_v57  ;;  %v376_v18 = vsub.f32 1.0, %v1078_v59  ;;  %v382_v22 = vmul.f32 0.0, %v1078_v59 }
 0x118   :  { %v374_v2 = vadd.f32 %v373_v63, %v204_v9 }
 0x11a   :  { %1079 = vtanh.f32 %v374_v2 }
 0x124   :  { %v1080_v7 = vpop.eup %1079 }
 0x125   :  { %378 = vrot.lane.b32.xlu0 %v1080_v7, %s1184_s27 }
 0x197   :  { %v379_v19 = vpop.permute.xlu0 %378 }
 0x198   :  { %v381_v23 = vmul.f32 %v379_v19, %v376_v18 }
 0x19a   :  { %v383_v24 = vadd.f32 %v382_v22, %v381_v23 }
 0x19c   :  { %v384_v26 = vpack.c.bf16 %v383_v24, %v383_v24 }
 0x19e   :  { %386 = vrot.lane.b32.xlu0 %v384_v26, %s1184_s27 }
 0x210   :  { %v387_v27 = vpop.permute.xlu0 %386 }
 0x211   :  { %993 = vmatmul.mubr.msk.bf16.vlgmr.msra.gmra.mrb[4].mxu0 %vm314_vm4, %v387_v27 }
 0x212   :  { %526 = vmatpush1.bf16.msra.mxu0 %v1265_v8  ;;  %557 = vmatprep.mubr.bf16.mxu0 %v1183_v1 }
 0x213   :  { %527 = vmatprep.subr.bf16.mxu0 %v1271_v10 }
 0x216   :  { %528 = vmatpush1.bf16.msra.mxu0 %v1277_v11 }
 0x217   :  { %529 = vmatprep.subr.bf16.mxu0 %v1286_v13 }
 0x21a   :  { %530 = vmatpush1.bf16.msra.mxu0 %v1293_v14 }
 0x21b   :  { %531 = vmatprep.subr.bf16.mxu0 %v1303_v16 }
 0x21e   :  { %532 = vmatpush1.bf16.msra.mxu0 %v1311_v17 }
 0x21f   :  { %659 = vmatprep.subr.bf16.mxu0 %v1260_v5 }
 0x2e4   :  { %v425_v9 = vpop.f32.mrb[4].mxu0 }
 0x2e5   :  { %v432_v20 = vadd.f32 %v425_v9, %v219_v6  ;;  %v427_v28 = vpop.f32.mrb[5].mxu0 }
 0x2e6   :  { %v429_v29 = vpop.f32.mrb[6].mxu0  ;;  %v439_v55 = vadd.f32 %v1479_v56, %v427_v28 }
 0x2e7   :  { %v994_v30 = vmul.f32 -1.442695, %v432_v20  ;;  %v430_v39 = vpop.f32.mrb[7].mxu0 }
 0x2e9   :  { %1081 = vpow2.f32 %v994_v30 }
 0x2f3   :  { %v1082_v41 = vpop.eup %1081 }
 0x2f4   :  { %v436_v53 = vadd.f32 1.0, %v1082_v41 }
 0x2f6   :  { %1083 = vrcp.f32 %v436_v53 }
 0x300   :  { %v1084_v57 = vpop.eup %1083 }
 0x301   :  { %v440_v59 = vmul.f32 %v1084_v57, %v439_v55  ;;  %v443_v2 = vsub.f32 1.0, %v1084_v57  ;;  %v449_v18 = vmul.f32 %v1084_v57, %v383_v24 }
 0x303   :  { %v441_v63 = vadd.f32 %v440_v59, %v220_v21 }
 0x305   :  { %1085 = vtanh.f32 %v441_v63 }
 0x30f   :  { %v1086_v6 = vpop.eup %1085 }
 0x310   :  { %445 = vrot.lane.b32.xlu1 %v1086_v6, %s1184_s27 }
 0x382   :  { %v446_v7 = vpop.permute.xlu1 %445 }
 0x383   :  { %v448_v19 = vmul.f32 %v446_v7, %v443_v2 }
 0x385   :  { %v450_v22 = vadd.f32 %v449_v18, %v448_v19 }
 0x387   :  { %v451_v23 = vpack.c.bf16 %v450_v22, %v450_v22 }
 0x389   :  { %453 = vrot.lane.b32.xlu1 %v451_v23, %s1184_s27 }
 0x3fb   :  { %v454_v26 = vpop.permute.xlu1 %453 }
 0x3fc   :  { %995 = vmatmul.mubr.msk.bf16.vlgmr.msra.gmra.mrb[4].mxu1 %vm314_vm4, %v454_v26 }
 0x3fd   :  { %593 = vmatpush1.bf16.msra.mxu1 %v1265_v8  ;;  %624 = vmatprep.mubr.bf16.mxu1 %v1183_v1 }
 0x3fe   :  { %594 = vmatprep.subr.bf16.mxu1 %v1271_v10 }
 0x401   :  { %595 = vmatpush1.bf16.msra.mxu1 %v1277_v11 }
 0x402   :  { %596 = vmatprep.subr.bf16.mxu1 %v1286_v13 }
 0x405   :  { %597 = vmatpush1.bf16.msra.mxu1 %v1293_v14 }
 0x406   :  { %598 = vmatprep.subr.bf16.mxu1 %v1303_v16 }
 0x409   :  { %599 = vmatpush1.bf16.msra.mxu1 %v1311_v17 }
 0x40a   :  { %726 = vmatprep.subr.bf16.mxu1 %v1260_v5 }
 0x4cf   :  { %v492_v21 = vpop.f32.mrb[4].mxu1 }
 0x4d0   :  { %v499_v24 = vadd.f32 %v492_v21, %v237_v31  ;;  %v494_v27 = vpop.f32.mrb[5].mxu1 }
 0x4d1   :  { %v496_v9 = vpop.f32.mrb[6].mxu1  ;;  %v506_v39 = vadd.f32 %v1479_v56, %v494_v27 }
 0x4d2   :  { %v996_v20 = vmul.f32 -1.442695, %v499_v24  ;;  %v497_v28 = vpop.f32.mrb[7].mxu1 }
 0x4d4   :  { %1087 = vpow2.f32 %v996_v20 }
 0x4de   :  { %v1088_v29 = vpop.eup %1087 }
 0x4df   :  { %v503_v30 = vadd.f32 1.0, %v1088_v29 }
 0x4e1   :  { %1089 = vrcp.f32 %v503_v30 }
 0x4eb   :  { %v1090_v41 = vpop.eup %1089 }
 0x4ec   :  { %v507_v53 = vmul.f32 %v1090_v41, %v506_v39  ;;  %v510_v57 = vsub.f32 1.0, %v1090_v41  ;;  %v516_v63 = vmul.f32 %v1090_v41, %v450_v22 }
 0x4ee   :  { %v508_v55 = vadd.f32 %v507_v53, %v238_v37 }
 0x4f0   :  { %1091 = vtanh.f32 %v508_v55 }
 0x4fa   :  { %v1092_v31 = vpop.eup %1091 }
 0x4fb   :  { %512 = vrot.lane.b32.xlu0 %v1092_v31, %s1184_s27 }
 0x56d   :  { %v513_v59 = vpop.permute.xlu0 %512 }
 0x56e   :  { %v515_v6 = vmul.f32 %v513_v59, %v510_v57 }
 0x570   :  { %v517_v2 = vadd.f32 %v516_v63, %v515_v6 }
 0x572   :  { %v518_v7 = vpack.c.bf16 %v517_v2, %v517_v2 }
 0x574   :  { %520 = vrot.lane.b32.xlu1 %v518_v7, %s1184_s27 }
 0x5e6   :  { %v521_v18 = vpop.permute.xlu1 %520 }
 0x5e7   :  { %997 = vmatmul.mubr.msk.bf16.vlgmr.msra.gmra.mrb[8].mxu0 %vm314_vm4, %v521_v18 }
 0x5e8   :  { %660 = vmatpush1.bf16.msra.mxu0 %v1265_v8  ;;  %691 = vmatprep.mubr.bf16.mxu0 %v1183_v1 }
 0x5e9   :  { %661 = vmatprep.subr.bf16.mxu0 %v1271_v10 }
 0x5ec   :  { %662 = vmatpush1.bf16.msra.mxu0 %v1277_v11 }
 0x5ed   :  { %663 = vmatprep.subr.bf16.mxu0 %v1286_v13 }
 0x5f0   :  { %664 = vmatpush1.bf16.msra.mxu0 %v1293_v14 }
 0x5f1   :  { %665 = vmatprep.subr.bf16.mxu0 %v1303_v16 }
 0x5f4   :  { %666 = vmatpush1.bf16.msra.mxu0 %v1311_v17 }
 0x5f5   :  { %793 = vmatprep.subr.bf16.mxu0 %v1260_v5 }
 0x6ba   :  { %v559_v37 = vpop.f32.mrb[8].mxu0 }
 0x6bb   :  { %v566_v19 = vadd.f32 %v559_v37, %v255_v40  ;;  %v561_v22 = vpop.f32.mrb[9].mxu0 }
 0x6bc   :  { %v563_v23 = vpop.f32.mrb[10].mxu0  ;;  %v573_v9 = vadd.f32 %v1479_v56, %v561_v22 }
 0x6bd   :  { %v998_v26 = vmul.f32 -1.442695, %v566_v19  ;;  %v564_v21 = vpop.f32.mrb[11].mxu0 }
 0x6bf   :  { %1093 = vpow2.f32 %v998_v26 }
 0x6c9   :  { %v1094_v24 = vpop.eup %1093 }
 0x6ca   :  { %v570_v27 = vadd.f32 1.0, %v1094_v24 }
 0x6cc   :  { %1095 = vrcp.f32 %v570_v27 }
 0x6d6   :  { %v1096_v20 = vpop.eup %1095 }
 0x6d7   :  { %v574_v28 = vmul.f32 %v1096_v20, %v573_v9  ;;  %v577_v29 = vsub.f32 1.0, %v1096_v20  ;;  %v583_v39 = vmul.f32 %v1096_v20, %v517_v2 }
 0x6d9   :  { %v575_v5 = vadd.f32 %v574_v28, %v256_v51 }
 0x6db   :  { %1097 = vtanh.f32 %v575_v5 }
 0x6e5   :  { %v1098_v40 = vpop.eup %1097 }
 0x6e6   :  { %579 = vrot.lane.b32.xlu0 %v1098_v40, %s1184_s27 }
 0x758   :  { %v580_v30 = vpop.permute.xlu0 %579 }
 0x759   :  { %v582_v41 = vmul.f32 %v580_v30, %v577_v29 }
 0x75b   :  { %v584_v53 = vadd.f32 %v583_v39, %v582_v41 }
 0x75d   :  { %v585_v55 = vpack.c.bf16 %v584_v53, %v584_v53 }
 0x75f   :  { %587 = vrot.lane.b32.xlu1 %v585_v55, %s1184_s27 }
 0x7d1   :  { %v588_v31 = vpop.permute.xlu1 %587 }
 0x7d2   :  { %999 = vmatmul.mubr.msk.bf16.vlgmr.msra.gmra.mrb[8].mxu1 %vm314_vm4, %v588_v31 }
 0x7d3   :  { %727 = vmatpush1.bf16.msra.mxu1 %v1265_v8  ;;  %758 = vmatprep.mubr.bf16.mxu1 %v1183_v1 }
 0x7d4   :  { %728 = vmatprep.subr.bf16.mxu1 %v1271_v10 }
 0x7d7   :  { %729 = vmatpush1.bf16.msra.mxu1 %v1277_v11 }
 0x7d8   :  { %730 = vmatprep.subr.bf16.mxu1 %v1286_v13 }
 0x7db   :  { %731 = vmatpush1.bf16.msra.mxu1 %v1293_v14 }
 0x7dc   :  { %732 = vmatprep.subr.bf16.mxu1 %v1303_v16 }
 0x7df   :  { %733 = vmatpush1.bf16.msra.mxu1 %v1311_v17 }
 0x8a5   :  { %v626_v51 = vpop.f32.mrb[8].mxu1 }
 0x8a6   :  { %v633_v57 = vadd.f32 %v626_v51, %v257_v42  ;;  %v628_v59 = vpop.f32.mrb[9].mxu1 }
 0x8a7   :  { %v630_v63 = vpop.f32.mrb[10].mxu1  ;;  %v640_v37 = vadd.f32 %v1479_v56, %v628_v59 }
 0x8a8   :  { %v1000_v6 = vmul.f32 -1.442695, %v633_v57  ;;  %v631_v2 = vpop.f32.mrb[11].mxu1 }
 0x8aa   :  { %1099 = vpow2.f32 %v1000_v6 }
 0x8b4   :  { %v1100_v7 = vpop.eup %1099 }
 0x8b5   :  { %v637_v18 = vadd.f32 1.0, %v1100_v7 }
 0x8b7   :  { %1101 = vrcp.f32 %v637_v18 }
 0x8c1   :  { %v1102_v19 = vpop.eup %1101 }
 0x8c2   :  { %v641_v22 = vmul.f32 %v1102_v19, %v640_v37  ;;  %v644_v38 = vsub.f32 1.0, %v1102_v19  ;;  %v650_v26 = vmul.f32 %v1102_v19, %v584_v53 }
 0x8c4   :  { %v642_v23 = vadd.f32 %v641_v22, %v258_v52 }
 0x8c6   :  { %1103 = vtanh.f32 %v642_v23 }
 0x8d0   :  { %v1104_v33 = vpop.eup %1103 }
 0x8d1   :  { %646 = vrot.lane.b32.xlu0 %v1104_v33, %s1184_s27 }
 0x943   :  { %v647_v42 = vpop.permute.xlu0 %646 }
 0x944   :  { %v649_v21 = vmul.f32 %v647_v42, %v644_v38 }
 0x946   :  { %v651_v24 = vadd.f32 %v650_v26, %v649_v21 }
 0x948   :  { %v652_v27 = vpack.c.bf16 %v651_v24, %v651_v24 }
 0x94a   :  { %654 = vrot.lane.b32.xlu1 %v652_v27, %s1184_s27 }
 0x9bc   :  { %v655_v9 = vpop.permute.xlu1 %654 }
 0x9bd   :  { %1001 = vmatmul.mubr.msk.bf16.vlgmr.msra.gmra.mrb[12].mxu0 %vm314_vm4, %v655_v9 }
 0x9be   :  { %794 = vmatpush1.bf16.msra.mxu0 %v1265_v8  ;;  %825 = vmatprep.mubr.bf16.mxu0 %v1183_v1 }
 0x9bf   :  { %795 = vmatprep.subr.bf16.mxu0 %v1271_v10 }
 0x9c2   :  { %796 = vmatpush1.bf16.msra.mxu0 %v1277_v11 }
 0x9c3   :  { %797 = vmatprep.subr.bf16.mxu0 %v1286_v13 }
 0x9c6   :  { %798 = vmatpush1.bf16.msra.mxu0 %v1293_v14 }
 0x9c7   :  { %799 = vmatprep.subr.bf16.mxu0 %v1303_v16 }
 0x9ca   :  { %800 = vmatpush1.bf16.msra.mxu0 %v1311_v17 }
 0xa90   :  { %v693_v43 = vpop.f32.mrb[12].mxu0 }
 0xa91   :  { %v700_v8 = vadd.f32 %v693_v43, %v259_v44  ;;  %v695_v1 = vpop.f32.mrb[13].mxu0  ;;  %v865_v43 = vld [vmem:[%s1680_s5 + $0x30] sm:$0xff] }
 0xa92   :  { %v697_v47 = vpop.f32.mrb[14].mxu0  ;;  %v707_v14 = vadd.f32 %v1479_v56, %v695_v1 }
 0xa93   :  { %v1002_v10 = vmul.f32 -1.442695, %v700_v8  ;;  %v698_v52 = vpop.f32.mrb[15].mxu0 }
 0xa95   :  { %1105 = vpow2.f32 %v1002_v10 }
 0xa9f   :  { %v1106_v11 = vpop.eup %1105 }
 0xaa0   :  { %v704_v13 = vadd.f32 1.0, %v1106_v11 }
 0xaa2   :  { %1107 = vrcp.f32 %v704_v13 }
 0xaac   :  { %v1108_v16 = vpop.eup %1107 }
 0xaad   :  { %v708_v20 = vmul.f32 %v1108_v16, %v707_v14  ;;  %v711_v25 = vsub.f32 1.0, %v1108_v16  ;;  %v717_v28 = vmul.f32 %v1108_v16, %v651_v24  ;;  %v864_v24 = vld [vmem:[%s1680_s5 + $0x28] sm:$0xff] }
 0xaaf   :  { %v709_v17 = vadd.f32 %v708_v20, %v260_v45 }
 0xab1   :  { %1109 = vtanh.f32 %v709_v17 }
 0xabb   :  { %v1110_v15 = vpop.eup %1109 }
 0xabc   :  { %713 = vrot.lane.b32.xlu0 %v1110_v15, %s1184_s27 }
 0xb2e   :  { %v714_v44 = vpop.permute.xlu0 %713 }
 0xb2f   :  { %v716_v5 = vmul.f32 %v714_v44, %v711_v25 }
 0xb31   :  { %v718_v40 = vadd.f32 %v717_v28, %v716_v5 }
 0xb33   :  { %v719_v29 = vpack.c.bf16 %v718_v40, %v718_v40 }
 0xb35   :  { %721 = vrot.lane.b32.xlu1 %v719_v29, %s1184_s27 }
 0xba7   :  { %v722_v30 = vpop.permute.xlu1 %721 }
 0xba8   :  { %1003 = vmatmul.mubr.msk.bf16.vlgmr.msra.gmra.mrb[12].mxu1 %vm314_vm4, %v722_v30 }
 0xba9   :  { %1035 = vmatprep.mubr.msk.f32.mxu1 %vm1186_vm5, %v1182_v0  ;;  %v866_v0 = vld [vmem:[%s1680_s5 + $0x38] sm:$0xff] }
 0xbaa   :  { %v1052_v8 = vpack.c.bf16 %v866_v0, %v865_v43 }
 0xc7b   :  { %v760_v39 = vpop.f32.mrb[12].mxu1 }
 0xc7c   :  { %v767_v35 = vadd.f32 %v760_v39, %v261_v46  ;;  %v762_v36 = vpop.f32.mrb[13].mxu1 }
 0xc7d   :  { %v764_v45 = vpop.f32.mrb[14].mxu1  ;;  %v774_v51 = vadd.f32 %v1479_v56, %v762_v36 }
 0xc7e   :  { %v1004_v41 = vmul.f32 -1.442695, %v767_v35  ;;  %v765_v53 = vpop.f32.mrb[15].mxu1 }
 0xc80   :  { %1111 = vpow2.f32 %v1004_v41 }
 0xc8a   :  { %v1112_v55 = vpop.eup %1111 }
 0xc8b   :  { %v771_v31 = vadd.f32 1.0, %v1112_v55 }
 0xc8d   :  { %1113 = vrcp.f32 %v771_v31 }
 0xc97   :  { %v1114_v57 = vpop.eup %1113 }
 0xc98   :  { %v775_v59 = vmul.f32 %v1114_v57, %v774_v51  ;;  %v778_v62 = vsub.f32 1.0, %v1114_v57  ;;  %v784_v6 = vmul.f32 %v1114_v57, %v718_v40 }
 0xc9a   :  { %v776_v63 = vadd.f32 %v775_v59, %v262_v48 }
 0xc9c   :  { %1115 = vtanh.f32 %v776_v63 }
 0xca6   :  { %v1116_v54 = vpop.eup %1115 }
 0xca7   :  { %780 = vrot.lane.b32.xlu0 %v1116_v54, %s1184_s27 }
 0xd19   :  { %v781_v46 = vpop.permute.xlu0 %780 }
 0xd1a   :  { %v783_v2 = vmul.f32 %v781_v46, %v778_v62 }
 0xd1c   :  { %v785_v7 = vadd.f32 %v784_v6, %v783_v2 }
 0xd1e   :  { %v786_v18 = vpack.c.bf16 %v785_v7, %v785_v7 }
 0xd20   :  { %788 = vrot.lane.b32.xlu1 %v786_v18, %s1184_s27 }
 0xd92   :  { %v789_v37 = vpop.permute.xlu1 %788 }
 0xd93   :  { %1005 = vmatmul.mubr.msk.bf16.vlgmr.msra.gmra.mrb[16].mxu0 %vm314_vm4, %v789_v37 }
 0xe66   :  { %v827_v19 = vpop.f32.mrb[16].mxu0 }
 0xe67   :  { %v834_v58 = vadd.f32 %v827_v19, %v263_v49  ;;  %v829_v12 = vpop.f32.mrb[17].mxu0  ;;  %v861_v49 = vld [vmem:[%s1680_s5 + $0x10] sm:$0xff] }
 0xe68   :  { %v831_v48 = vpop.f32.mrb[18].mxu0  ;;  %v841_v42 = vadd.f32 %v1479_v56, %v829_v12  ;;  %v1185_v56 = vmov 0.0|0.0   ;;  %v1046_v4 = vpack.c.bf16 %v862_v3, %v861_v49 }
 0xe69   :  { %v1006_v22 = vmul.f32 -1.442695, %v834_v58  ;;  %v832_v23 = vpop.f32.mrb[19].mxu0  ;;  %1042 = vmatprep.subr.bf16.mxu1 %v1185_v56 }
 0xe6a   :  { %1044 = vmatpush3.bf16.msra.mxu1 %v1043_v34 }
 0xe6b   :  { %1117 = vpow2.f32 %v1006_v22  ;;  %1045 = vmatprep.subr.bf16.mxu1 %v1185_v56 }
 0xe6e   :  { %1047 = vmatpush3.bf16.msra.mxu1 %v1046_v4 }
 0xe6f   :  { %1048 = vmatprep.subr.bf16.mxu1 %v1185_v56 }
 0xe75   :  { %v1118_v33 = vpop.eup %1117 }
 0xe76   :  { %v838_v38 = vadd.f32 1.0, %v1118_v33 }
 0xe78   :  { %1119 = vrcp.f32 %v838_v38 }
 0xe82   :  { %v1120_v26 = vpop.eup %1119 }
 0xe83   :  { %v842_v21 = vmul.f32 %v1120_v26, %v841_v42  ;;  %v845_v1 = vsub.f32 1.0, %v1120_v26  ;;  %v851_v10 = vmul.f32 %v1120_v26, %v785_v7 }
 0xe85   :  { %v843_v32 = vadd.f32 %v842_v21, %v264_v50  ;;  %v863_v50 = vld [vmem:[%s1680_s5 + $0x20] sm:$0xff]  ;;  %s970_s5 = sshll.u32 %s1187_s22, 4  ;;  %s971_s5 = int_to_ptr.vmem [resolvable:$true] %s970_s5 }
 0xe86   :  { %v1049_v27 = vpack.c.bf16 %v864_v24, %v863_v50  ;;  %s1153_s23 = scalar_lea.vmem %s971_s5, 32  ;;  %p1158_p9 = scmp.lt.s32.totalorder %s971_s5, %s971_s5 }
 0xe87   :  { %1121 = vtanh.f32 %v843_v32  ;;  %p1154_p8 = scmp.ne.s32.totalorder %s971_s5, %s1153_s23  ;;  %p1159_p10 = scmp.lt.s32.totalorder %s1153_s23, %s1153_s23 }
 0xe88   :  { %1050 = vmatpush3.bf16.msra.mxu1 %v1049_v27 }
 0xe89   :  { %1051 = vmatprep.subr.bf16.mxu1 %v1185_v56  ;;  %p1160_p11 = por %p1159_p10, %p1158_p9 }
 0xe8b   :  { %p1161_p12 = pnand %p1160_p11, %p1154_p8 }
 0xe8c   :  { %1053 = vmatpush3.bf16.msra.mxu1 %v1052_v8 }
 0xe91   :  { %v1122_v9 = vpop.eup %1121 }
 0xe92   :  { %847 = vrot.lane.b32.xlu0 %v1122_v9, %s1184_s27 }
 0xf04   :  { %v848_v47 = vpop.permute.xlu0 %847 }
 0xf05   :  { %v850_v52 = vmul.f32 %v848_v47, %v845_v1 }
 0xf07   :  { %v852_v11 = vadd.f32 %v851_v10, %v850_v52 }
 0xf09   :  { %854 = vrot.lane.b32.xlu1 %v852_v11, %s1184_s27 }
 0xf7b   :  { %v855_v13 = vpop.permute.xlu1 %854 }
 0xf7c   :  { %1036 = vmatmul.mubr.msk.f32.vlgmr.msra.gmra.mrb[16].mxu1 %vm314_vm4, %v855_v13  ;;  %858 = vst.msk [vmem:[#allocation8] sm:$0x3] %vm857_vm6, %v855_v13 }
 0xf7d   :  { %1164 = shalt.err (!%p1161_p12)
}
 0xf7e   :  { %s1165_s0 = scalar_lea.hbm %s1685_s10, 32 }
 0xf7f   :  { %p1166_p13 = scmp.ne.s32.totalorder %s1685_s10, %s1165_s0  ;;  %p1169_p0 = scmp.lt.u32.totalorder %s1165_s0, %s1685_s10 }
 0xf81   :  { %p1171_p1 = pnand %p1169_p0, %p1166_p13 }
 0xf83   :  { %1174 = shalt.err (!%p1171_p1)
}
 0xf84   :  { %973 = dma.vmem_to_hbm [thread:$0]  %s971_s5, 32, %s1685_s10, [#allocation7]   ;;  %v868_v14 = vstv %s1681_s6  ;;  %v943_v15 = vstv %s1682_s7  ;;  %v946_v44 = vstv %s1683_s8  ;;  %vm960_vm7 = vcmask 1024  }
0x104f   :  { %v937_v16 = vpop.f32.mrb[16].mxu1 }
0x1050   :  { %v938_v20 = vadd.f32 %v937_v16, %v868_v14  ;;  %v1037_v17 = vpop.f32.mrb[17].mxu1 }
0x1052   :  { %v941_v25 = vmax.f32 %v938_v20, 0.0 }
0x1054   :  { %v944_v28 = vmul.f32 %v943_v15, %v941_v25 }
0x1056   :  { %v947_v5 = vadd.f32 %v946_v44, %v944_v28 }
0x1058   :  { %v1008_v40 = vmul.f32 -1.442695, %v947_v5 }
0x105a   :  { %1123 = vpow2.f32 %v1008_v40 }
0x1064   :  { %v1124_v29 = vpop.eup %1123 }
0x1065   :  { %v951_v30 = vadd.f32 1.0, %v1124_v29 }
0x1067   :  { %1125 = vrcp.f32 %v951_v30 }
0x1071   :  { %v1126_v39 = vpop.eup %1125 }
0x1072   :  { %v1009_v35 = vmul.f32 -1.442695, %v1126_v39 }
0x1074   :  { %1127 = vpow2.f32 %v1009_v35 }
0x107e   :  { %v1128_v36 = vpop.eup %1127 }
0x107f   :  { %v957_v45 = vadd.f32 1.0, %v1128_v36 }
0x1081   :  { %1129 = vrcp.f32 %v957_v45 }
0x108b   :  { %v1130_v41 = vpop.eup %1129 }
0x108c   :  { %961 = vst.msk [vmem:[%s1684_s9] sm:$0x3] %vm960_vm7, %v1130_v41 }
0x108d   :  { %1177 = dma.done.wait [#allocation7], 32  }
0x108e   :  { %1178 = vsyncadd [#allocation7], 4294967264 }
0x108f   :  { %979 = vsyncpa [#allocation6], 1 }
0x1090   :  { %980 = vsyncpa [#allocation7], 1 }

</bundles_post_ra>
